<compile_context>
chip_gen: v6e
topology: v6e:2x2x1
jax: 0.10.0
libtpu: 0.0.40
codegen_flags: <defaults>
</compile_context>

<pallas_src>
import functools
import math

import jax
import jax.numpy as jnp
import numpy as np
from jax.experimental import pallas as pl
from jax.experimental.pallas import tpu as pltpu


# ---------------------------------------------------------------------------
# helpers
# ---------------------------------------------------------------------------
def _round_up(v, m):
    return (v + m - 1) // m * m


# ---------------------------------------------------------------------------
# Pallas kernels
# ---------------------------------------------------------------------------
def _conv_kernel(x_ref, w_ref, b_ref, o_ref, *, offsets, tm, win):
    """NHWC conv as a shifted-row matmul (no im2col).

    x_ref : (rows, Cin)        bf16, full flattened activation (resident).
    w_ref : (ntaps, Cin, Cout) bf16, one (Cin, Cout) matrix per kernel tap.
    b_ref : (1, Cout)          f32.
    o_ref : (tm, Cout)         bf16, rows [i*tm, i*tm+tm) of the "loose" output;
            rows whose spatial position is outside the valid conv output are
            garbage and are sliced away by the wrapper.
    """
    i = pl.program_id(0)
    base = pl.multiple_of(i * tm, 256)             # tm is always a multiple of 256
    xw_bf = x_ref[pl.ds(base, win), :]             # (win, Cin), aligned dyn. slice
    xw_f32 = xw_bf.astype(jnp.float32)             # roll on unpacked f32 sublanes

    acc = jnp.zeros(o_ref.shape, jnp.float32)
    for t, off in enumerate(offsets):
        if off == 0:
            lhs = xw_bf[:tm, :]
        else:
            # lhs[j, :] = xw[j + off, :]   (no wrap-around: off <= win - tm)
            lhs = pltpu.roll(xw_f32, shift=win - off, axis=0)[:tm, :]
            lhs = lhs.astype(jnp.bfloat16)
        acc = acc + jnp.dot(lhs, w_ref[t], preferred_element_type=jnp.float32)
    o_ref[...] = (acc + b_ref[...]).astype(o_ref.dtype)


def _cbam_kernel(x_ref, w1_ref, b1_ref, w2_ref, b2_ref, spmat_ref, o_ref):
    """Fused CBAM: ChannelGate (avg/max pool -> shared MLP -> sigmoid scale),
    ChannelPool, 7x7 SpatialGate conv (as dense (HW,HW) matrices), sigmoid
    scaling and the residual add.  All math kept in f32 (v5e-friendly)."""
    x = x_ref[0]                                              # (C=300, HW=96)
    c, hw = x.shape
    avg_p = jnp.sum(x, axis=1, keepdims=True) * (1.0 / hw)    # (C, 1)
    max_p = jnp.max(x, axis=1, keepdims=True)                 # (C, 1)

    def mlp(v):
        h = jnp.dot(w1_ref[...], v, preferred_element_type=jnp.float32) + b1_ref[...]
        h = jnp.maximum(h, 0.0)
        return jnp.dot(w2_ref[...], h, preferred_element_type=jnp.float32) + b2_ref[...]

    att = mlp(avg_p) + mlp(max_p)                             # (C, 1)
    ch_scale = 1.0 / (1.0 + jnp.exp(-att))                    # sigmoid
    xch = x * ch_scale                                        # (C, HW)

    max_c = jnp.max(xch, axis=0, keepdims=True)               # (1, HW)
    mean_c = jnp.sum(xch, axis=0, keepdims=True) * (1.0 / c)  # (1, HW)
    sp = (jnp.dot(max_c, spmat_ref[0], preferred_element_type=jnp.float32)
          + jnp.dot(mean_c, spmat_ref[1], preferred_element_type=jnp.float32))
    sp_scale = 1.0 / (1.0 + jnp.exp(-sp))                     # (1, HW)
    # out = x2 + SpatialGate(ChannelGate(x2))   (residual fused)
    o_ref[0] = x + xch * sp_scale
    # TODO(synk): HW=96 leaves the lane dim 75% utilized; padding to 128 needs
    #             -inf masking of the spatial max and is not worth it for this
    #             ~115 KB/sample op.


def _head_kernel(a_ref, w1_ref, b1_ref, w2_ref, b2_ref, o_ref, acc_ref):
    """Fused fc1 (K-tiled, f32 accumulator) + fc2 + softmax.  Padded fc2
    columns carry a -1e30 bias so they vanish under the softmax."""
    k = pl.program_id(0)

    @pl.when(k == 0)
    def _init():
        acc_ref[...] = jnp.zeros_like(acc_ref)

    acc_ref[...] += jnp.dot(a_ref[...], w1_ref[...],
                            preferred_element_type=jnp.float32)

    @pl.when(k == pl.num_programs(0) - 1)
    def _finish():
        h = acc_ref[...] + b1_ref[...]                           # fc1 (no ReLU in ref)
        logits = jnp.dot(h, w2_ref[...],
                         preferred_element_type=jnp.float32) + b2_ref[...]
        m = jnp.max(logits, axis=-1, keepdims=True)
        e = jnp.exp(logits - m)
        o_ref[...] = e / jnp.sum(e, axis=-1, keepdims=True)


# ---------------------------------------------------------------------------
# Pallas wrappers
# ---------------------------------------------------------------------------
def conv2d_nhwc(x, w_packed, b, kh, kw, tm_max=1024):
    """Valid (no-pad, stride-1) NHWC conv via the shifted-row matmul kernel."""
    n, h, wd, cin = x.shape
    ntaps, cin_p, cout = w_packed.shape
    ho, wo = h - kh + 1, wd - kw + 1
    offsets = tuple(dh * wd + dw for dh in range(kh) for dw in range(kw))

    m = n * h * wd
    tm = min(tm_max, _round_up(m, 256))
    nt = pl.cdiv(m, tm)
    halo = _round_up(max(offsets), 16)     # 16 = bf16 sublane-pack granularity
    rows = nt * tm + halo
    x_flat = jnp.pad(x.reshape(m, cin).astype(jnp.bfloat16),
                     ((0, rows - m), (0, cin_p - cin)))

    out = pl.pallas_call(
        functools.partial(_conv_kernel, offsets=offsets, tm=tm, win=tm + halo),
        out_shape=jax.ShapeDtypeStruct((nt * tm, cout), jnp.bfloat16),
        grid_spec=pltpu.PrefetchScalarGridSpec(
            num_scalar_prefetch=0,
            grid=(nt,),
            in_specs=[
                pl.BlockSpec((rows, cin_p), lambda i: (0, 0)),       # resident
                pl.BlockSpec((ntaps, cin_p, cout), lambda i: (0, 0, 0)),
                pl.BlockSpec((1, cout), lambda i: (0, 0)),
            ],
            out_specs=pl.BlockSpec((tm, cout), lambda i: (i, 0)),
        ),
        compiler_params=pltpu.CompilerParams(
            dimension_semantics=("parallel",)),
    )(x_flat, w_packed, b)
    return out[:m].reshape(n, h, wd, cout)[:, :ho, :wo, :]


def pool2d_nhwc(x, window, mode):
    """MaxPool2d / AvgPool2d with floor semantics (plain-JAX glue reduction)."""
    ph, pw = window
    n, h, w, c = x.shape
    ho, wo = h // ph, w // pw
    xr = x[:, :ho * ph, :wo * pw, :].reshape(n, ho, ph, wo, pw, c)
    if mode == 'max':
        return jnp.max(xr, axis=(2, 4))
    return jnp.mean(xr, axis=(2, 4))


def cbam_forward(x_flat, p):
    """x_flat: (N, C=300, HW=96) f32.  Returns x_flat + SpatialGate(ChannelGate(x))."""
    n, c, hw = x_flat.shape
    return pl.pallas_call(
        _cbam_kernel,
        out_shape=jax.ShapeDtypeStruct((n, c, hw), jnp.float32),
        grid_spec=pltpu.PrefetchScalarGridSpec(
            num_scalar_prefetch=0,
            grid=(n,),
            in_specs=[
                pl.BlockSpec((1, c, hw), lambda i: (i, 0, 0)),
                pl.BlockSpec(p['mlp_w1'].shape, lambda i: (0, 0)),
                pl.BlockSpec(p['mlp_b1'].shape, lambda i: (0, 0)),
                pl.BlockSpec(p['mlp_w2'].shape, lambda i: (0, 0)),
                pl.BlockSpec(p['mlp_b2'].shape, lambda i: (0, 0)),
                pl.BlockSpec(p['sp_mat'].shape, lambda i: (0, 0, 0)),
            ],
            out_specs=pl.BlockSpec((1, c, hw), lambda i: (i, 0, 0)),
        ),
        compiler_params=pltpu.CompilerParams(
            dimension_semantics=("parallel",)),
    )(x_flat, p['mlp_w1'], p['mlp_b1'], p['mlp_w2'], p['mlp_b2'], p['sp_mat'])


def head_forward(feat, p, tk=2560):
    """Fused fc1(15360->512) + fc2(512->6) + softmax."""
    n, k = feat.shape
    mp = 8                                           # pad batch to 8 sublanes only
    assert k % tk == 0
    a = jnp.pad(feat.astype(jnp.bfloat16), ((0, mp - n), (0, 0)))
    out = pl.pallas_call(
        _head_kernel,
        out_shape=jax.ShapeDtypeStruct((mp, 128), jnp.float32),
        grid_spec=pltpu.PrefetchScalarGridSpec(
            num_scalar_prefetch=0,
            grid=(k // tk,),
            in_specs=[
                pl.BlockSpec((mp, tk), lambda kk: (0, kk)),
                pl.BlockSpec((tk, 512), lambda kk: (kk, 0)),
                pl.BlockSpec((1, 512), lambda kk: (0, 0)),
                pl.BlockSpec((512, 128), lambda kk: (0, 0)),
                pl.BlockSpec((1, 128), lambda kk: (0, 0)),
            ],
            out_specs=pl.BlockSpec((mp, 128), lambda kk: (0, 0)),
            scratch_shapes=[pltpu.VMEM((mp, 512), jnp.float32)],
        ),
        compiler_params=pltpu.CompilerParams(
            dimension_semantics=("arbitrary",)),
    )(a, p['fc1_wT'], p['fc1_b'], p['fc2_wT'], p['fc2_b'])
    return out[:n, :6]


# ---------------------------------------------------------------------------
# Parameters (deterministic, init_layer-style uniform; weights pre-packed once)
# ---------------------------------------------------------------------------
def _init_weight(key, shape, fan_in):
    std = math.sqrt(2.0 / fan_in)
    scale = std * math.sqrt(3.0)
    return jax.random.uniform(key, shape, jnp.float32, -scale, scale)


def _pack_conv(w, b, scale=1.0):
    """(Cout,Cin,kh,kw) -> (kh*kw, Cin_pad, Cout) bf16 + (1,Cout) f32 bias."""
    cout, cin, kh, kw = w.shape
    cin_p = _round_up(cin, 8)
    wp = jnp.transpose(w, (2, 3, 1, 0)).reshape(kh * kw, cin, cout) * scale
    wp = jnp.pad(wp, ((0, 0), (0, cin_p - cin), (0, 0)))
    return wp.astype(jnp.bfloat16), (b * scale).reshape(1, cout).astype(jnp.float32)


def _spatial_conv_matrices(sp_w, hh, ww, ksz=7):
    """(1,2,k,k) conv weights -> (2, HW, HW) dense matrices implementing the
    zero-padded kxk conv on an (hh,ww) grid: out[q] = sum_p in_ch[p]*M[ch,p,q]."""
    pad = (ksz - 1) // 2
    hw = hh * ww
    mat = np.zeros((2, hw, hw), np.float32)
    w_np = np.asarray(sp_w)
    for ch in range(2):
        for ho in range(hh):
            for wo in range(ww):
                q = ho * ww + wo
                for dh in range(ksz):
                    for dw in range(ksz):
                        hi, wi = ho + dh - pad, wo + dw - pad
                        if 0 <= hi < hh and 0 <= wi < ww:
                            mat[ch, hi * ww + wi, q] += w_np[0, ch, dh, dw]
    return jnp.asarray(mat)


def make_params(key):
    keys = iter(jax.random.split(key, 40))
    bn_s = 1.0 / math.sqrt(1.0 + 1e-5)   # eval-mode BN: gamma=1, beta=0, mean=0, var=1
    p = {}

    # --- CBAM (gate_channels=300, reduction=4) ---
    c_gate, red = 300, 4
    p['mlp_w1'] = _init_weight(next(keys), (c_gate // red, c_gate), c_gate)
    p['mlp_b1'] = jnp.zeros((c_gate // red, 1), jnp.float32)
    p['mlp_w2'] = _init_weight(next(keys), (c_gate, c_gate // red), c_gate // red)
    p['mlp_b2'] = jnp.zeros((c_gate, 1), jnp.float32)
    sp_w = _init_weight(next(keys), (1, 2, 7, 7), 2 * 7 * 7) * bn_s   # BN(1) folded
    p['sp_w'] = sp_w                                  # kept for the reference check
    p['sp_mat'] = _spatial_conv_matrices(sp_w, 32, 3, 7)              # (2, 96, 96)

    # --- CNN stack (eval-mode BN folded into the 2nd conv of every layer) ---
    layer_defs = [  # (cin, cmid, k1, cout, k2, pool)
        (3, 64, (1, 3), 64, (1, 3), (1, 2)),
        (64, 64, (3, 1), 128, (3, 1), (2, 1)),
        (128, 128, (1, 3), 128, (1, 3), (1, 2)),
        (128, 128, (3, 1), 128, (3, 1), (2, 1)),
        (128, 256, (3, 1), 256, (3, 1), (2, 1)),
        (256, 512, (3, 1), 512, (3, 1), (2, 2)),
    ]
    layers = []
    for cin, cmid, k1, cout, k2, pool in layer_defs:
        w_a = _init_weight(next(keys), (cmid, cin, *k1), cin * k1[0] * k1[1])
        w_b = _init_weight(next(keys), (cout, cmid, *k2), cmid * k2[0] * k2[1])
        wa_p, ba_p = _pack_conv(w_a, jnp.zeros((cmid,), jnp.float32))
        wb_p, bb_p = _pack_conv(w_b, jnp.zeros((cout,), jnp.float32), scale=bn_s)
        layers.append((wa_p, ba_p, k1, wb_p, bb_p, k2, pool))
    p['cnn_layers'] = layers

    # --- FC head (pre-transposed / pre-padded once) ---
    fc1_w = _init_weight(next(keys), (512, 1024 * 15), 1024 * 15)
    p['fc1_wT'] = jnp.transpose(fc1_w).astype(jnp.bfloat16)            # (15360, 512)
    p['fc1_b'] = jnp.zeros((1, 512), jnp.float32)
    fc2_w = _init_weight(next(keys), (6, 512), 512)
    p['fc2_wT'] = jnp.pad(jnp.transpose(fc2_w), ((0, 0), (0, 128 - 6)))  # (512, 128)
    p['fc2_b'] = jnp.concatenate(
        [jnp.zeros((1, 6), jnp.float32),
         jnp.full((1, 128 - 6), -1e30, jnp.float32)], axis=1)          # mask pad cols
    return p


# ---------------------------------------------------------------------------
# Full forward pass
# ---------------------------------------------------------------------------
def forward(x, p):
    n = x.shape[0]
    # x: (N, 3, 300, 32) -> x2 = permute(0,2,3,1): (N, 300, 32, 3)
    x2 = jnp.transpose(x, (0, 2, 3, 1))
    # Fused CBAM (includes the "x2 + spatial_out" residual).
    cb = cbam_forward(x2.reshape(n, 300, 96).astype(jnp.float32), p)
    # (N,300,32,3) is already channels-last (H=300, W=32, C=3) for the CNN, so
    # no transpose back to NCHW is needed; the whole CNN runs NHWC in bf16.
    h = cb.reshape(n, 300, 32, 3).astype(jnp.bfloat16)

    for wa, ba, k1, wb, bb, k2, pool in p['cnn_layers']:
        h = conv2d_nhwc(h, wa, ba, *k1)
        h = conv2d_nhwc(h, wb, bb, *k2)           # eval-mode BN folded into wb/bb
        h = pool2d_nhwc(h, pool, 'max')

    out61 = pool2d_nhwc(h, (1, 2), 'max')         # (N, 15, 1, 512)
    out62 = pool2d_nhwc(h, (1, 2), 'avg')
    feat = jnp.concatenate([out61, out62], axis=-1)            # (N, 15, 1, 1024)
    # tiny reorder to match torch.cat(dim=1) + .view(N,-1) feature ordering
    feat = jnp.transpose(feat, (0, 3, 1, 2)).reshape(n, -1)    # (N, 1024*15)
    return head_forward(feat, p)                  # fused fc1 + fc2 + softmax


# ---------------------------------------------------------------------------
# Pure-JAX references (used only for unit checks in __main__)
# ---------------------------------------------------------------------------
def _conv_reference(x_nhwc, w_packed, b, kh, kw):
    cin = x_nhwc.shape[-1]
    cout = w_packed.shape[-1]
    w = jnp.transpose(
        w_packed.astype(jnp.float32)[:, :cin, :].reshape(kh, kw, cin, cout),
        (3, 2, 0, 1))
    out = jax.lax.conv_general_dilated(
        x_nhwc.astype(jnp.float32), w, (1, 1), 'VALID',
        dimension_numbers=('NHWC', 'OIHW', 'NHWC'),
        precision=jax.lax.Precision.HIGHEST)
    return out + b.reshape(1, 1, 1, cout)


def _cbam_reference(x_flat, p):
    n, c, hw = x_flat.shape
    x = x_flat
    avg = jnp.mean(x, axis=2)
    mx = jnp.max(x, axis=2)

    def mlp(v):
        h = jnp.maximum(v @ p['mlp_w1'].T + p['mlp_b1'][:, 0], 0.0)
        return h @ p['mlp_w2'].T + p['mlp_b2'][:, 0]

    att = jax.nn.sigmoid(mlp(avg) + mlp(mx))
    xch = x * att[:, :, None]
    pool = jnp.stack([jnp.max(xch, axis=1), jnp.mean(xch, axis=1)], axis=1)
    sp = jax.lax.conv_general_dilated(
        pool.reshape(n, 2, 32, 3), p['sp_w'], (1, 1), ((3, 3), (3, 3)),
        dimension_numbers=('NCHW', 'OIHW', 'NCHW'),
        precision=jax.lax.Precision.HIGHEST).reshape(n, 1, hw)
    return x + xch * jax.nn.sigmoid(sp)


if __name__ == "__main__":
    key = jax.random.PRNGKey(0)
    kx, kp, kt1, kt2, ktw = jax.random.split(key, 5)
    params = make_params(kp)

    # --- unit checks: shifted-row conv kernel vs lax.conv (same bf16 operands) ---
    for (kh, kw), (th, tw, tcin, tcout) in (((1, 3), (10, 12, 16, 32)),
                                            ((3, 1), (20, 14, 32, 64))):
        xt = jax.random.normal(kt1, (2, th, tw, tcin), jnp.float32).astype(jnp.bfloat16)
        wt = jax.random.normal(ktw, (tcout, tcin, kh, kw), jnp.float32) * 0.1
        bt = jax.random.normal(kt2, (tcout,), jnp.float32) * 0.1
        wp, bp = _pack_conv(wt, bt)
        got = conv2d_nhwc(xt, wp, bp, kh, kw).astype(jnp.float32)
        want = _conv_reference(xt, wp, bp, kh, kw)
        assert bool(jnp.allclose(got, want, atol=5e-2, rtol=5e-2)), \
            float(jnp.max(jnp.abs(got - want)))

    # --- unit check: fused CBAM kernel vs pure-JAX reference ---
    xc = jax.random.normal(kt1, (2, 300, 96), jnp.float32)
    got = cbam_forward(xc, params)
    want = _cbam_reference(xc, params)
    assert bool(jnp.allclose(got, want, atol=5e-2, rtol=5e-2)), \
        float(jnp.max(jnp.abs(got - want)))

    # --- full forward ---
    # Shapes forced by the module: CBAM(300) => 300 "channels" after permute,
    # fc1=Linear(1024*15, 512) => CNN output 15x1 spatial => input (N, 3, 300, 32).
    x = jax.random.normal(kx, (2, 3, 300, 32), dtype=jnp.float32)
    fwd = jax.jit(lambda xx: forward(xx, params))
    out = jax.block_until_ready(fwd(x))
    assert out.shape == (2, 6), out.shape
    assert bool(jnp.all(jnp.isfinite(out)))
    assert bool(jnp.allclose(jnp.sum(out, axis=1), 1.0, atol=1e-3))
    print("KERNEL_OK")
</pallas_src>

<mosaic_0001>
module attributes {stable_mosaic.version = 11 : i64} {
  func.func @_conv_kernel(%arg0: i32, %arg1: memref<272x16xbf16, #tpu.memory_space<vmem>>, %arg2: memref<3x16x32xbf16, #tpu.memory_space<vmem>>, %arg3: memref<1x32xf32, #tpu.memory_space<vmem>>, %arg4: memref<256x32xbf16, #tpu.memory_space<vmem>>) attributes {dimension_semantics = [#tpu.dimension_semantics<parallel>], iteration_bounds = array<i64: 1>, scalar_prefetch = 0 : i64, scratch_operands = 0 : i64, tpu.core_type = #tpu.core_type<tc>, window_params = [{pipeline_mode = #tpu.pipeline_mode<synchronous>, transform_indices = @transform_0, window_bounds = array<i64: 272, 16>}, {pipeline_mode = #tpu.pipeline_mode<synchronous>, transform_indices = @transform_1, window_bounds = array<i64: 3, 16, 32>}, {pipeline_mode = #tpu.pipeline_mode<synchronous>, transform_indices = @transform_2, window_bounds = array<i64: 1, 32>}, {transform_indices = @transform_3, window_bounds = array<i64: 256, 32>}]} {
    %c256_i32 = arith.constant 256 : i32
    %0 = arith.muli %arg0, %c256_i32 : i32
    %1 = tpu.assume_multiple %0, 256 : i32
    %2 = arith.index_cast %1 : i32 to index
    %c0 = arith.constant 0 : index
    %3 = vector.load %arg1[%2, %c0] : memref<272x16xbf16, #tpu.memory_space<vmem>>, vector<272x16xbf16>
    %4 = arith.extf %3 : vector<272x16xbf16> to vector<272x16xf32>
    %cst = arith.constant 0.000000e+00 : f32
    %5 = vector.broadcast %cst : f32 to vector<256x32xf32>
    %6 = vector.extract_strided_slice %3 {offsets = [0, 0], sizes = [256, 16], strides = [1, 1]} : vector<272x16xbf16> to vector<256x16xbf16>
    %c0_0 = arith.constant 0 : index
    %c0_1 = arith.constant 0 : index
    %c0_2 = arith.constant 0 : index
    %7 = vector.load %arg2[%c0_0, %c0_1, %c0_2] : memref<3x16x32xbf16, #tpu.memory_space<vmem>>, vector<1x16x32xbf16>
    %8 = vector.shape_cast %7 : vector<1x16x32xbf16> to vector<16x32xbf16>
    %cst_3 = arith.constant dense<0.000000e+00> : vector<256x32xf32>
    %9 = tpu.matmul %6, %8, %cst_3 {dimension_numbers = #tpu.dot_dimension_numbers<[1], [0], [0], [1], [0, 0, 1, 1], [], []>} : vector<256x16xbf16>, vector<16x32xbf16>, vector<256x32xf32> -> vector<256x32xf32>
    %10 = arith.addf %5, %9 : vector<256x32xf32>
    %c271_i32 = arith.constant 271 : i32
    %11 = tpu.dynamic_rotate %4 by %c271_i32 dim 0 : vector<272x16xf32>, i32 -> vector<272x16xf32>
    %12 = vector.extract_strided_slice %11 {offsets = [0, 0], sizes = [256, 16], strides = [1, 1]} : vector<272x16xf32> to vector<256x16xf32>
    %13 = arith.truncf %12 : vector<256x16xf32> to vector<256x16xbf16>
    %c1 = arith.constant 1 : index
    %c0_4 = arith.constant 0 : index
    %c0_5 = arith.constant 0 : index
    %14 = vector.load %arg2[%c1, %c0_4, %c0_5] : memref<3x16x32xbf16, #tpu.memory_space<vmem>>, vector<1x16x32xbf16>
    %15 = vector.shape_cast %14 : vector<1x16x32xbf16> to vector<16x32xbf16>
    %cst_6 = arith.constant dense<0.000000e+00> : vector<256x32xf32>
    %16 = tpu.matmul %13, %15, %cst_6 {dimension_numbers = #tpu.dot_dimension_numbers<[1], [0], [0], [1], [0, 0, 1, 1], [], []>} : vector<256x16xbf16>, vector<16x32xbf16>, vector<256x32xf32> -> vector<256x32xf32>
    %17 = arith.addf %10, %16 : vector<256x32xf32>
    %c270_i32 = arith.constant 270 : i32
    %18 = tpu.dynamic_rotate %4 by %c270_i32 dim 0 : vector<272x16xf32>, i32 -> vector<272x16xf32>
    %19 = vector.extract_strided_slice %18 {offsets = [0, 0], sizes = [256, 16], strides = [1, 1]} : vector<272x16xf32> to vector<256x16xf32>
    %20 = arith.truncf %19 : vector<256x16xf32> to vector<256x16xbf16>
    %c2 = arith.constant 2 : index
    %c0_7 = arith.constant 0 : index
    %c0_8 = arith.constant 0 : index
    %21 = vector.load %arg2[%c2, %c0_7, %c0_8] : memref<3x16x32xbf16, #tpu.memory_space<vmem>>, vector<1x16x32xbf16>
    %22 = vector.shape_cast %21 : vector<1x16x32xbf16> to vector<16x32xbf16>
    %cst_9 = arith.constant dense<0.000000e+00> : vector<256x32xf32>
    %23 = tpu.matmul %20, %22, %cst_9 {dimension_numbers = #tpu.dot_dimension_numbers<[1], [0], [0], [1], [0, 0, 1, 1], [], []>} : vector<256x16xbf16>, vector<16x32xbf16>, vector<256x32xf32> -> vector<256x32xf32>
    %24 = arith.addf %17, %23 : vector<256x32xf32>
    %c0_10 = arith.constant 0 : index
    %c0_11 = arith.constant 0 : index
    %25 = vector.load %arg3[%c0_10, %c0_11] : memref<1x32xf32, #tpu.memory_space<vmem>>, vector<1x32xf32>
    %26 = vector.broadcast %25 : vector<1x32xf32> to vector<256x32xf32>
    %27 = arith.addf %24, %26 : vector<256x32xf32>
    %28 = arith.truncf %27 : vector<256x32xf32> to vector<256x32xbf16>
    %c0_12 = arith.constant 0 : index
    %c0_13 = arith.constant 0 : index
    %29 = vector.load %arg4[%c0_12, %c0_13] : memref<256x32xbf16, #tpu.memory_space<vmem>>, vector<256x32xbf16>
    tpu.vector_store %arg4[%c0_12, %c0_13], %28 {strides = array<i32>} : memref<256x32xbf16, #tpu.memory_space<vmem>>, vector<256x32xbf16>,
    return
  }
  func.func @transform_0(%arg0: i32) -> (i32, i32) {
    %c0_i32 = arith.constant 0 : i32
    %c0_i32_0 = arith.constant 0 : i32
    %c0_i32_1 = arith.constant 0 : i32
    return %c0_i32, %c0_i32_0 : i32, i32
  }
  func.func @transform_1(%arg0: i32) -> (i32, i32, i32) {
    %c0_i32 = arith.constant 0 : i32
    %c0_i32_0 = arith.constant 0 : i32
    %c0_i32_1 = arith.constant 0 : i32
    %c0_i32_2 = arith.constant 0 : i32
    return %c0_i32, %c0_i32_0, %c0_i32_1 : i32, i32, i32
  }
  func.func @transform_2(%arg0: i32) -> (i32, i32) {
    %c0_i32 = arith.constant 0 : i32
    %c0_i32_0 = arith.constant 0 : i32
    %c0_i32_1 = arith.constant 0 : i32
    return %c0_i32, %c0_i32_0 : i32, i32
  }
  func.func @transform_3(%arg0: i32) -> (i32, i32) {
    %c0_i32 = arith.constant 0 : i32
    %c0_i32_0 = arith.constant 0 : i32
    return %arg0, %c0_i32 : i32, i32
  }
}

</mosaic_0001>

<bundles_post_ra>
// kernel: tpu_custom_call.1
= control target key start
LH: loop header
LB: loop body
LE: loop exit
PB: predicated region body
PF: predicated region fallthrough
CT: control target
= control target key end

     0   :  { %v121_v0 = vlaneseq  ;;  %vm181_vm1 = vcmask 130048   ;;  %vm1185_vm3 = vcmask 257024   ;;  %s2294_s1 = inlined_call_operand.vmem [shape: bf16[3,16,32], index: 1, kind: input, shape index: {}]   ;;  %s2295_s0 = inlined_call_operand.vmem [shape: bf16[272,16], index: 0, kind: input, shape index: {}]   ;;  %s2296_s2 = inlined_call_operand.vmem [shape: f32[1,32], index: 2, kind: input, shape index: {}]   ;;  %s2297_s3 = inlined_call_operand.vmem [shape: bf16[256,32], index: 3, kind: output, shape index: {}]  }
   0x1   :  { %v1515_v1 = vld [vmem:[%s2294_s1 + $0x8] sm:$0xff]   ;;  %v1576_v2 = vld [vmem:[%s2295_s0] sm:$0xff]   ;;  %v1611_v17 = vld [vmem:[%s2295_s0 + $0x10] sm:$0xff]  }
   0x2   :  { %v1581_v3 = vld [vmem:[%s2295_s0 + $0x8] sm:$0xff]   ;;  %v1583_v4 = vshrl.u32 %v121_v0, 7  ;;  %v1588_v5 = vld [vmem:[%s2295_s0 + $0x40] sm:$0xff]   ;;  %1513 = vmatprep.subr.bf16.mxu1 %v1515_v1  ;;  %1411 = vmatprep.subr.bf16.mxu0 %v1515_v1  ;;  %v53_v6 = vunpack.c.l.bf16 %v1576_v2  ;;  %v54_v7 = vunpack.c.h.bf16 %v1576_v2  ;;  %v1518_v18 = vld [vmem:[%s2294_s1 + $0x10] sm:$0xff]   ;;  %v57_v29 = vunpack.c.l.bf16 %v1611_v17 }
   0x3   :  { %v55_v8 = vunpack.c.l.bf16 %v1581_v3  ;;  %1514 = vmatpush3.bf16.msra.mxu1 %v1515_v1  ;;  %1412 = vmatpush3.bf16.msra.mxu0 %v1515_v1  ;;  %v1597_v9 = vld [vmem:[%s2295_s0 + $0x48] sm:$0xff]   ;;  %v69_v10 = vunpack.c.l.bf16 %v1588_v5  ;;  %v1603_v11 = vld [vmem:[%s2294_s1] sm:$0xff]   ;;  %v56_v15 = vunpack.c.h.bf16 %v1581_v3  ;;  %v70_v16 = vunpack.c.h.bf16 %v1588_v5  ;;  %v1628_v23 = vld [vmem:[%s2295_s0 + $0x50] sm:$0xff]  }
   0x4   :  { %vm123_vm0 = vcmp.lt.s32.totalorder %v1583_v4, 7  ;;  %v88_v12 = vrot.slane %v53_v6, 1  ;;  %v89_v13 = vrot.slane %v54_v7, 1  ;;  %1445 = vmatprep.subr.bf16.mxu1 %v1603_v11  ;;  %v71_v21 = vunpack.c.l.bf16 %v1597_v9  ;;  %1479 = vmatprep.subr.bf16.mxu0 %v1518_v18  ;;  %v1650_v34 = vld [vmem:[%s2295_s0 + $0x18] sm:$0xff]   ;;  %v1679_v48 = vld [vmem:[%s2295_s0 + $0x20] sm:$0xff]   ;;  %v1707_v62 = vld [vmem:[%s2295_s0 + $0x28] sm:$0xff]  }
   0x5   :  { %v90_v14 = vrot.slane %v55_v8, 1  ;;  %v1623_v22 = vrot.slane %v69_v10, 1  ;;  %v105_v25 = vrot.slane %v70_v16, 1  ;;  %v1632_v26 = vrot.slane %v53_v6, 2  ;;  %v1662_v39 = vld [vmem:[%s2295_s0 + $0x58] sm:$0xff]   ;;  %v1690_v53 = vld [vmem:[%s2295_s0 + $0x60] sm:$0xff]  }
   0x6   :  { %v155_v20 = vsel %vm123_vm0, %v88_v12, %v89_v13  ;;  %v1634_v27 = vrot.slane %v54_v7, 2  ;;  %v106_v28 = vrot.slane %v71_v21, 1  ;;  %v91_v31 = vrot.slane %v56_v15, 1 }
   0x7   :  { %v154_v19 = vsel %vm123_vm0, %v89_v13, %v90_v14  ;;  %v139_v30 = vsel %vm123_vm0, %v1623_v22, %v105_v25  ;;  %v72_v32 = vunpack.c.h.bf16 %v1597_v9  ;;  %v73_v33 = vunpack.c.l.bf16 %v1628_v23 }
   0x8   :  { %v156_v24 = vpack.c.bf16 %v154_v19, %v155_v20  ;;  %v1652_v35 = vrot.slane %v55_v8, 2  ;;  %v138_v36 = vsel %vm123_vm0, %v105_v25, %v106_v28  ;;  %v92_v37 = vrot.slane %v57_v29, 1 }
   0x9   :  { %v58_v38 = vunpack.c.h.bf16 %v1611_v17  ;;  %v164_v40 = vpack.c.bf16 %v138_v36, %v139_v30  ;;  %v153_v41 = vsel %vm123_vm0, %v90_v14, %v91_v31  ;;  %v107_v42 = vrot.slane %v72_v32, 1 }
   0xa   :  { %1413 = vmatprep.mubr.msk.bf16.mxu0 %vm181_vm1, %v156_v24  ;;  %v108_v43 = vrot.slane %v73_v33, 1  ;;  %v152_v44 = vsel %vm123_vm0, %v91_v31, %v92_v37  ;;  %v59_v45 = vunpack.c.l.bf16 %v1650_v34  ;;  %v2300_v47 = vunpack.c.h.bf16 %v1628_v23  ;;  %v1744_v31 = vld [vmem:[%s2295_s0 + $0x30] sm:$0xff]  }
   0xb   :  { %v93_v46 = vrot.slane %v58_v38, 1  ;;  %1429 = vmatprep.mubr.msk.bf16.mxu1 %vm181_vm1, %v164_v40  ;;  %v157_v49 = vpack.c.bf16 %v152_v44, %v153_v41  ;;  %v137_v51 = vsel %vm123_vm0, %v106_v28, %v107_v42  ;;  %v75_v52 = vunpack.c.l.bf16 %v1662_v39 }
   0xc   :  { %v136_v50 = vsel %vm123_vm0, %v107_v42, %v108_v43  ;;  %v94_v55 = vrot.slane %v59_v45, 1  ;;  %v109_v57 = vrot.slane %v2300_v47, 1  ;;  %v60_v59 = vunpack.c.h.bf16 %v1650_v34  ;;  %v1756_v42 = vld [vmem:[%s2295_s0 + $0x70] sm:$0xff]  }
   0xd   :  { %v165_v54 = vpack.c.bf16 %v136_v50, %v137_v51  ;;  %v151_v56 = vsel %vm123_vm0, %v92_v37, %v93_v46  ;;  %1414 = vmatmul.mubr.msk.bf16.vlgmr.msra.gmra.mxu0 %vm181_vm1, %v157_v49  ;;  %v110_v58 = vrot.slane %v75_v52, 1  ;;  %v61_v60 = vunpack.c.l.bf16 %v1679_v48 }
   0xe   :  { %v76_v61 = vunpack.c.h.bf16 %v1662_v39  ;;  %1480 = vmatpush3.bf16.msra.mxu0 %v1518_v18  ;;  %v150_v63 = vsel %vm123_vm0, %v93_v46, %v94_v55  ;;  %v135_v0 = vsel %vm123_vm0, %v108_v43, %v109_v57  ;;  %v77_v1 = vunpack.c.l.bf16 %v1690_v53 }
   0xf   :  { %1430 = vmatmul.mubr.msk.bf16.vlgmr.msra.gmra.mxu1 %vm181_vm1, %v165_v54  ;;  %v62_v6 = vunpack.c.h.bf16 %v1679_v48  ;;  %v158_v7 = vpack.c.bf16 %v150_v63, %v151_v56  ;;  %v134_v8 = vsel %vm123_vm0, %v109_v57, %v110_v58  ;;  %v95_v12 = vrot.slane %v60_v59, 1  ;;  %v1772_v56 = vld [vmem:[%s2295_s0 + $0x38] sm:$0xff]  }
  0x10   :  { %1446 = vmatpush3.bf16.msra.mxu1 %v1603_v11  ;;  %v96_v13 = vrot.slane %v61_v60, 1  ;;  %v166_v14 = vpack.c.bf16 %v134_v8, %v135_v0  ;;  %v111_v18 = vrot.slane %v76_v61, 1  ;;  %v112_v19 = vrot.slane %v77_v1, 1  ;;  %v1731_v11 = vld [vmem:[%s2295_s0 + $0x68] sm:$0xff]  }
  0x11   :  { %v63_v20 = vunpack.c.l.bf16 %v1707_v62  ;;  %1417 = vmatprep.mubr.msk.bf16.mxu0 %vm181_vm1, %v158_v7  ;;  %v149_v25 = vsel %vm123_vm0, %v94_v55, %v95_v12  ;;  %v97_v28 = vrot.slane %v62_v6, 1  ;;  %v2298_v30 = vunpack.c.h.bf16 %v1690_v53 }
  0x12   :  { %v148_v24 = vsel %vm123_vm0, %v95_v12, %v96_v13  ;;  %1433 = vmatprep.mubr.msk.bf16.mxu1 %vm181_vm1, %v166_v14  ;;  %v132_v37 = vsel %vm123_vm0, %v111_v18, %v112_v19  ;;  %v133_v40 = vsel %vm123_vm0, %v110_v58, %v111_v18  ;;  %v79_v46 = vunpack.c.l.bf16 %v1731_v11 }
  0x13   :  { %v159_v36 = vpack.c.bf16 %v148_v24, %v149_v25  ;;  %v98_v41 = vrot.slane %v63_v20, 1  ;;  %v167_v43 = vpack.c.bf16 %v132_v37, %v133_v40  ;;  %v147_v44 = vsel %vm123_vm0, %v96_v13, %v97_v28  ;;  %v1797_v24 = vld [vmem:[%s2295_s0 + $0x78] sm:$0xff]  }
  0x14   :  { %v113_v49 = vrot.slane %v2298_v30, 1  ;;  %vm719_vm2 = vcmp.lt.s32.totalorder %v1583_v4, 6  ;;  %v64_v51 = vunpack.c.h.bf16 %v1707_v62  ;;  %v65_v54 = vunpack.c.l.bf16 %v1744_v31 }
  0x15   :  { %v146_v50 = vsel %vm123_vm0, %v97_v28, %v98_v41  ;;  %v80_v55 = vunpack.c.h.bf16 %v1731_v11  ;;  %1418 = vmatmul.mubr.msk.bf16.gmra.mxu0 %vm181_vm1, %v159_v36  ;;  %v114_v58 = vrot.slane %v79_v46, 1  ;;  %v81_v0 = vunpack.c.l.bf16 %v1756_v42 }
  0x16   :  { %v160_v57 = vpack.c.bf16 %v146_v50, %v147_v44  ;;  %v131_v63 = vsel %vm123_vm0, %v112_v19, %v113_v49  ;;  %v99_v7 = vrot.slane %v64_v51, 1  ;;  %v100_v8 = vrot.slane %v65_v54, 1 }
  0x17   :  { %1434 = vmatmul.mubr.msk.bf16.gmra.mxu1 %vm181_vm1, %v167_v43  ;;  %v115_v12 = vrot.slane %v80_v55, 1  ;;  %v66_v13 = vunpack.c.h.bf16 %v1744_v31  ;;  %v130_v14 = vsel %vm123_vm0, %v113_v49, %v114_v58  ;;  %v116_v18 = vrot.slane %v81_v0, 1  ;;  %v1809_v43 = vld [vmem:[%s2295_s0 + $0x80] sm:$0xf] }
  0x18   :  { %1421 = vmatprep.mubr.msk.bf16.mxu0 %vm181_vm1, %v160_v57  ;;  %v67_v19 = vunpack.c.l.bf16 %v1772_v56  ;;  %v2299_v25 = vunpack.c.h.bf16 %v1756_v42  ;;  %v168_v28 = vpack.c.bf16 %v130_v14, %v131_v63  ;;  %v144_v36 = vsel %vm123_vm0, %v99_v7, %v100_v8 }
  0x19   :  { %v145_v37 = vsel %vm123_vm0, %v98_v41, %v99_v7  ;;  %v129_v40 = vsel %vm123_vm0, %v114_v58, %v115_v12  ;;  %v128_v49 = vsel %vm123_vm0, %v115_v12, %v116_v18  ;;  %v101_v50 = vrot.slane %v66_v13, 1 }
  0x1a   :  { %v161_v44 = vpack.c.bf16 %v144_v36, %v145_v37  ;;  %v102_v57 = vrot.slane %v67_v19, 1  ;;  %1437 = vmatprep.mubr.msk.bf16.mxu1 %vm181_vm1, %v168_v28  ;;  %v169_v41 = vpack.c.bf16 %v128_v49, %v129_v40  ;;  %v83_v58 = vunpack.c.l.bf16 %v1797_v24 }
  0x1b   :  { %v117_v63 = vrot.slane %v2299_v25, 1  ;;  %v68_v7 = vunpack.c.h.bf16 %v1772_v56  ;;  %v143_v12 = vsel %vm123_vm0, %v100_v8, %v101_v50  ;;  %v84_v36 = vunpack.c.h.bf16 %v1797_v24 }
  0x1c   :  { %v142_v14 = vsel %vm123_vm0, %v101_v50, %v102_v57  ;;  %v85_v37 = vunpack.c.l.bf16 %v1809_v43  ;;  %v118_v28 = vrot.slane %v83_v58, 1 }
  0x1d   :  { %v162_v30 = vpack.c.bf16 %v142_v14, %v143_v12  ;;  %v127_v40 = vsel %vm123_vm0, %v116_v18, %v117_v63  ;;  %v103_v49 = vrot.slane %v68_v7, 1  ;;  %1422 = vmatmul.mubr.msk.bf16.gmra.mxu0 %vm181_vm1, %v161_v44  ;;  %v119_v25 = vrot.slane %v84_v36, 1 }
  0x1e   :  { %v120_v8 = vrot.slane %v85_v37, 1  ;;  %v126_v50 = vsel %vm123_vm0, %v117_v63, %v118_v28  ;;  %v690_v63 = vrot.slane %v57_v29, 2 }
  0x1f   :  { %1438 = vmatmul.mubr.msk.bf16.gmra.mxu1 %vm181_vm1, %v169_v41  ;;  %1425 = vmatprep.mubr.msk.bf16.mxu0 %vm181_vm1, %v162_v30  ;;  %v140_v18 = vsel %vm123_vm0, %v103_v49, %v1623_v22  ;;  %v141_v44 = vsel %vm123_vm0, %v102_v57, %v103_v49  ;;  %v170_v14 = vpack.c.bf16 %v126_v50, %v127_v40  ;;  %v689_v41 = vrot.slane %v56_v15, 2 }
  0x20   :  { %v124_v12 = vsel %vm123_vm0, %v119_v25, %v120_v8  ;;  %v125_v47 = vsel %vm123_vm0, %v118_v28, %v119_v25  ;;  %v750_v30 = vsel %vm719_vm2, %v1634_v27, %v1652_v35  ;;  %v751_v22 = vsel %vm719_vm2, %v1632_v26, %v1634_v27 }
  0x21   :  { %1441 = vmatprep.mubr.msk.bf16.mxu1 %vm181_vm1, %v170_v14  ;;  %v163_v57 = vpack.c.bf16 %v140_v18, %v141_v44  ;;  %v171_v25 = vpack.c.bf16 %v124_v12, %v125_v47  ;;  %v752_v28 = vpack.c.bf16 %v750_v30, %v751_v22  ;;  %v691_v40 = vrot.slane %v58_v38, 2 }
  0x22   :  { %v692_v49 = vrot.slane %v59_v45, 2  ;;  %v749_v26 = vsel %vm719_vm2, %v1652_v35, %v689_v41  ;;  %v748_v15 = vsel %vm719_vm2, %v689_v41, %v690_v63  ;;  %v1885_v38 = vrot.slane %v71_v21, 2 }
  0x23   :  { %v747_v29 = vsel %vm719_vm2, %v690_v63, %v691_v40  ;;  %v753_v35 = vpack.c.bf16 %v748_v15, %v749_v26  ;;  %v693_v45 = vrot.slane %v60_v59, 2  ;;  %v694_v47 = vrot.slane %v61_v60, 2 }
  0x24   :  { %v746_v27 = vsel %vm719_vm2, %v691_v40, %v692_v49  ;;  %v696_v50 = vrot.slane %v63_v20, 2  ;;  %v705_v18 = vrot.slane %v72_v32, 2  ;;  %v1899_v21 = vrot.slane %v73_v33, 2 }
  0x25   :  { %1426 = vmatmul.mubr.msk.bf16.gmra.mxu0 %vm181_vm1, %v163_v57  ;;  %v754_v8 = vpack.c.bf16 %v746_v27, %v747_v29  ;;  %v1903_v59 = vrot.slane %v75_v52, 2  ;;  %v709_v60 = vrot.slane %v76_v61, 2  ;;  %v744_v32 = vsel %vm719_vm2, %v693_v45, %v694_v47 }
  0x26   :  { %1481 = vmatprep.mubr.msk.bf16.mxu0 %vm181_vm1, %v752_v28  ;;  %v1917_v33 = vsel %vm719_vm2, %v705_v18, %v1899_v21  ;;  %v733_v52 = vsel %vm719_vm2, %v1885_v38, %v705_v18  ;;  %v745_v61 = vsel %vm719_vm2, %v692_v49, %v693_v45  ;;  %v712_v12 = vrot.slane %v79_v46, 2 }
  0x27   :  { %1442 = vmatmul.mubr.msk.bf16.gmra.mxu1 %vm181_vm1, %v171_v25  ;;  %v729_v14 = vsel %vm719_vm2, %v1903_v59, %v709_v60  ;;  %v713_v22 = vrot.slane %v80_v55, 2  ;;  %v755_v57 = vpack.c.bf16 %v744_v32, %v745_v61  ;;  %v697_v41 = vrot.slane %v64_v51, 2 }
  0x28   :  { %1447 = vmatprep.mubr.msk.bf16.mxu1 %vm181_vm1, %v1576_v2  ;;  %v695_v2 = vrot.slane %v62_v6, 2  ;;  %v1909_v6 = vrot.slane %v77_v1, 2  ;;  %v761_v1 = vpack.c.bf16 %v1917_v33, %v733_v52  ;;  %v716_v63 = vrot.slane %v83_v58, 2 }
  0x29   :  { %v698_v28 = vrot.slane %v65_v54, 2  ;;  %v725_v55 = vsel %vm719_vm2, %v712_v12, %v713_v22  ;;  %v700_v40 = vrot.slane %v67_v19, 2  ;;  %v717_v58 = vrot.slane %v84_v36, 2 }
  0x2a   :  { %v1931_v20 = vsel %vm719_vm2, %v709_v60, %v1909_v6  ;;  %v742_v44 = vsel %vm719_vm2, %v695_v2, %v696_v50  ;;  %v718_v49 = vrot.slane %v85_v37, 2  ;;  %v741_v19 = vsel %vm719_vm2, %v696_v50, %v697_v41 }
  0x2b   :  { %v763_v30 = vpack.c.bf16 %v1931_v20, %v729_v14  ;;  %v721_v54 = vsel %vm719_vm2, %v716_v63, %v717_v58  ;;  %v702_v15 = vrot.slane %v69_v10, 2  ;;  %v701_v29 = vrot.slane %v68_v7, 2 }
  0x2c   :  { %v720_v43 = vsel %vm719_vm2, %v717_v58, %v718_v49  ;;  %v2302_v50 = vunpack.c.h.bf16 %v1690_v53 }
  0x2d   :  { %1482 = vmatmul.mubr.msk.bf16.vlgmr.msra.gmra.mxu0 %vm181_vm1, %v753_v35  ;;  %v767_v37 = vpack.c.bf16 %v720_v43, %v721_v54  ;;  %v703_v35 = vrot.slane %v70_v16, 2  ;;  %v737_v10 = vsel %vm719_vm2, %v700_v40, %v701_v29 }
  0x2e   :  { %1485 = vmatprep.mubr.msk.bf16.mxu0 %vm181_vm1, %v754_v8  ;;  %v711_v18 = vrot.slane %v2302_v50, 2 }
  0x2f   :  { %1448 = vmatmul.mubr.msk.bf16.vlgmr.msra.gmra.mxu1 %vm181_vm1, %v1581_v3  ;;  %v743_v3 = vsel %vm719_vm2, %v694_v47, %v695_v2  ;;  %v734_v16 = vsel %vm719_vm2, %v703_v35, %v1885_v38  ;;  %v735_v7 = vsel %vm719_vm2, %v702_v15, %v703_v35  ;;  %v2301_v47 = vunpack.c.h.bf16 %v1628_v23 }
  0x30   :  { %1451 = vmatprep.mubr.msk.bf16.mxu1 %vm181_vm1, %v1611_v17  ;;  %v714_v17 = vrot.slane %v81_v0, 2  ;;  %v756_v25 = vpack.c.bf16 %v742_v44, %v743_v3  ;;  %v699_v0 = vrot.slane %v66_v13, 2  ;;  %v740_v13 = vsel %vm719_vm2, %v697_v41, %v698_v28 }
  0x31   :  { %v757_v26 = vpack.c.bf16 %v740_v13, %v741_v19  ;;  %v707_v8 = vrot.slane %v2301_v47, 2 }
  0x32   :  { %v724_v46 = vsel %vm719_vm2, %v713_v22, %v714_v17  ;;  %v738_v36 = vsel %vm719_vm2, %v699_v0, %v700_v40 }
  0x33   :  { %v765_v51 = vpack.c.bf16 %v724_v46, %v725_v55  ;;  %v731_v38 = vsel %vm719_vm2, %v1899_v21, %v707_v8 }
  0x35   :  { %1486 = vmatmul.mubr.msk.bf16.gmra.mxu0 %vm181_vm1, %v755_v57 }
  0x36   :  { %1489 = vmatprep.mubr.msk.bf16.mxu0 %vm181_vm1, %v756_v25 }
  0x37   :  { %1452 = vmatmul.mubr.msk.bf16.gmra.mxu1 %vm181_vm1, %v1650_v34  ;;  %v739_v34 = vsel %vm719_vm2, %v698_v28, %v699_v0 }
  0x38   :  { %1455 = vmatprep.mubr.msk.bf16.mxu1 %vm181_vm1, %v1679_v48  ;;  %v758_v27 = vpack.c.bf16 %v738_v36, %v739_v34  ;;  %v736_v48 = vsel %vm719_vm2, %v701_v29, %v702_v15  ;;  %v2107_v34 = vld [vmem:[%s2296_s2] ss:$0 sm:$0xff] }
  0x39   :  { %v759_v45 = vpack.c.bf16 %v736_v48, %v737_v10 }
  0x3d   :  { %1490 = vmatmul.mubr.msk.bf16.gmra.mxu0 %vm181_vm1, %v757_v26 }
  0x3e   :  { %1493 = vmatprep.mubr.msk.bf16.mxu0 %vm181_vm1, %v758_v27 }
  0x3f   :  { %1456 = vmatmul.mubr.msk.bf16.gmra.mxu1 %vm181_vm1, %v1707_v62  ;;  %v760_v62 = vpack.c.bf16 %v734_v16, %v735_v7 }
  0x40   :  { %1459 = vmatprep.mubr.msk.bf16.mxu1 %vm181_vm1, %v1744_v31  ;;  %v730_v31 = vsel %vm719_vm2, %v707_v8, %v1903_v59  ;;  %v2303_v59 = vunpack.c.h.bf16 %v1756_v42 }
  0x41   :  { %v762_v2 = vpack.c.bf16 %v730_v31, %v731_v38 }
  0x42   :  { %v715_v60 = vrot.slane %v2303_v59, 2 }
  0x45   :  { %1494 = vmatmul.mubr.msk.bf16.gmra.mxu0 %vm181_vm1, %v759_v45 }
  0x46   :  { %1497 = vmatprep.mubr.msk.bf16.mxu0 %vm181_vm1, %v760_v62 }
  0x47   :  { %1460 = vmatmul.mubr.msk.bf16.gmra.mxu1 %vm181_vm1, %v1772_v56  ;;  %v727_v56 = vsel %vm719_vm2, %v1909_v6, %v711_v18 }
  0x48   :  { %1463 = vmatprep.mubr.msk.bf16.mxu1 %vm181_vm1, %v1588_v5  ;;  %v726_v5 = vsel %vm719_vm2, %v711_v18, %v712_v12 }
  0x49   :  { %v764_v21 = vpack.c.bf16 %v726_v5, %v727_v56 }
  0x4d   :  { %1498 = vmatmul.mubr.msk.bf16.gmra.mxu0 %vm181_vm1, %v761_v1 }
  0x4e   :  { %1501 = vmatprep.mubr.msk.bf16.mxu0 %vm181_vm1, %v762_v2 }
  0x4f   :  { %1464 = vmatmul.mubr.msk.bf16.gmra.mxu1 %vm181_vm1, %v1597_v9  ;;  %v722_v9 = vsel %vm719_vm2, %v715_v60, %v716_v63 }
  0x50   :  { %1467 = vmatprep.mubr.msk.bf16.mxu1 %vm181_vm1, %v1628_v23  ;;  %v723_v23 = vsel %vm719_vm2, %v714_v17, %v715_v60 }
  0x51   :  { %v766_v6 = vpack.c.bf16 %v722_v9, %v723_v23 }
  0x55   :  { %1502 = vmatmul.mubr.msk.bf16.gmra.mxu0 %vm181_vm1, %v763_v30 }
  0x56   :  { %1505 = vmatprep.mubr.msk.bf16.mxu0 %vm181_vm1, %v764_v21 }
  0x57   :  { %1468 = vmatmul.mubr.msk.bf16.gmra.mxu1 %vm181_vm1, %v1662_v39 }
  0x58   :  { %1471 = vmatprep.mubr.msk.bf16.mxu1 %vm181_vm1, %v1690_v53 }
  0x5d   :  { %1506 = vmatmul.mubr.msk.bf16.gmra.mxu0 %vm181_vm1, %v765_v51 }
  0x5e   :  { %1509 = vmatprep.mubr.msk.bf16.mxu0 %vm181_vm1, %v766_v6 }
  0x5f   :  { %1472 = vmatmul.mubr.msk.bf16.gmra.mxu1 %vm181_vm1, %v1731_v11 }
  0x60   :  { %1475 = vmatprep.mubr.msk.bf16.mxu1 %vm181_vm1, %v1756_v42 }
  0x65   :  { %1510 = vmatmul.mubr.msk.bf16.gmra.mxu0 %vm181_vm1, %v767_v37 }
  0x67   :  { %1476 = vmatmul.mubr.msk.bf16.gmra.mxu1 %vm181_vm1, %v1797_v24 }
  0xcd   :  { %v1415_v39 = vpop.f32.mrf.mxu0 }
  0xcf   :  { %v2054_v53 = vpop.f32.mrf.mxu1  ;;  %v264_v4 = vpop.f32.mrf.mxu0 }
  0xd1   :  { %v2056_v32 = vpop.f32.mrf.mxu1  ;;  %v1416_v33 = vpop.f32.mrf.mxu0 }
  0xd3   :  { %v2058_v52 = vpop.f32.mrf.mxu1  ;;  %v267_v11 = vpop.f32.mrf.mxu0 }
  0xd5   :  { %v2060_v61 = vpop.f32.mrf.mxu1  ;;  %v1419_v1 = vpop.f32.mrf.mxu0 }
  0xd7   :  { %v2062_v20 = vpop.f32.mrf.mxu1  ;;  %v280_v42 = vpop.f32.mrf.mxu0 }
  0xd9   :  { %v2064_v44 = vpop.f32.mrf.mxu1  ;;  %v1420_v3 = vpop.f32.mrf.mxu0 }
  0xdb   :  { %v2066_v24 = vpop.f32.mrf.mxu1  ;;  %v2068_v14 = vpop.f32.mrf.mxu0 }
  0xdd   :  { %v2070_v12 = vpop.f32.mrf.mxu1  ;;  %v2072_v30 = vpop.f32.mrf.mxu0 }
  0xdf   :  { %v2074_v22 = vpop.f32.mrf.mxu1  ;;  %v2076_v17 = vpop.f32.mrf.mxu0 }
  0xe1   :  { %v2078_v57 = vpop.f32.mrf.mxu1  ;;  %v2080_v41 = vpop.f32.mrf.mxu0 }
  0xe3   :  { %v2082_v63 = vpop.f32.mrf.mxu1  ;;  %v2084_v25 = vpop.f32.mrf.mxu0 }
  0xe5   :  { %v2086_v28 = vpop.f32.mrf.mxu1  ;;  %v2088_v46 = vpop.f32.mrf.mxu0 }
  0xe7   :  { %v2090_v55 = vpop.f32.mrf.mxu1  ;;  %v2092_v0 = vpop.f32.mrf.mxu0 }
  0xe9   :  { %v2094_v40 = vpop.f32.mrf.mxu1  ;;  %v2096_v51 = vpop.f32.mrf.mxu0 }
  0xeb   :  { %v2098_v58 = vpop.f32.mrf.mxu1  ;;  %v2100_v49 = vpop.f32.mrf.mxu0 }
  0xed   :  { %v2102_v54 = vpop.f32.mrf.mxu1  ;;  %v1483_v13 = vpop.f32.mrf.mxu0 }
  0xef   :  { %v1449_v19 = vpop.f32.mrf.mxu1  ;;  %v859_v36 = vpop.f32.mrf.mxu0 }
  0xf0   :  { %v568_v43 = vadd.f32 %v1449_v19, %v1415_v39 }
  0xf1   :  { %v559_v37 = vpop.f32.mrf.mxu1  ;;  %v1484_v27 = vpop.f32.mrf.mxu0 }
  0xf2   :  { %v988_v26 = vadd.f32 %v1483_v13, %v568_v43  ;;  %v560_v15 = vadd.f32 %v559_v37, %v264_v4 }
  0xf3   :  { %v1450_v29 = vpop.f32.mrf.mxu1  ;;  %v862_v16 = vpop.f32.mrf.mxu0 }
  0xf4   :  { %v1027_v35 = vadd.f32 %v2107_v34, %v988_v26  ;;  %v986_v48 = vadd.f32 %v859_v36, %v560_v15  ;;  %v571_v10 = vadd.f32 %v1450_v29, %v1416_v33 }
  0xf5   :  { %v562_v7 = vpop.f32.mrf.mxu1  ;;  %v1487_v31 = vpop.f32.mrf.mxu0 }
  0xf6   :  { %v1330_v45 = vpack.c.bf16 %v1027_v35, %v1027_v35  ;;  %v1025_v62 = vadd.f32 %v2107_v34, %v986_v48  ;;  %v989_v47 = vadd.f32 %v1484_v27, %v571_v10  ;;  %v563_v8 = vadd.f32 %v562_v7, %v267_v11 }
  0xf7   :  { %v1453_v38 = vpop.f32.mrf.mxu1  ;;  %v875_v56 = vpop.f32.mrf.mxu0 }
  0xf8   :  { %1188 = vst.msk [vmem:[%s2297_s3 + $0x8] sm:$0xf] %vm1185_vm3, %v1330_v45  ;;  %v1328_v2 = vpack.c.bf16 %v1025_v62, %v1025_v62  ;;  %v1028_v50 = vadd.f32 %v2107_v34, %v989_v47  ;;  %v987_v18 = vadd.f32 %v862_v16, %v563_v8  ;;  %v584_v5 = vadd.f32 %v1453_v38, %v1419_v1 }
  0xf9   :  { %v575_v21 = vpop.f32.mrf.mxu1  ;;  %v1488_v6 = vpop.f32.mrf.mxu0 }
  0xfa   :  { %1186 = vst.msk [vmem:[%s2297_s3] sm:$0xf] %vm1185_vm3, %v1328_v2  ;;  %v1331_v59 = vpack.c.bf16 %v1028_v50, %v1028_v50  ;;  %v1026_v60 = vadd.f32 %v2107_v34, %v987_v18  ;;  %v992_v9 = vadd.f32 %v1487_v31, %v584_v5  ;;  %v576_v23 = vadd.f32 %v575_v21, %v280_v42 }
  0xfb   :  { %v1454_v39 = vpop.f32.mrf.mxu1  ;;  %v878_v13 = vpop.f32.mrf.mxu0 }
  0xfc   :  { %1189 = vst.msk [vmem:[%s2297_s3 + $0xc] sm:$0xf] %vm1185_vm3, %v1331_v59  ;;  %v1329_v4 = vpack.c.bf16 %v1026_v60, %v1026_v60  ;;  %v1031_v33 = vadd.f32 %v2107_v34, %v992_v9  ;;  %v990_v11 = vadd.f32 %v875_v56, %v576_v23  ;;  %v587_v1 = vadd.f32 %v1454_v39, %v1420_v3 }
  0xfd   :  { %v578_v19 = vpop.f32.mrf.mxu1  ;;  %v1491_v26 = vpop.f32.mrf.mxu0 }
  0xfe   :  { %1187 = vst.msk [vmem:[%s2297_s3 + $0x4] sm:$0xf] %vm1185_vm3, %v1329_v4  ;;  %v1334_v42 = vpack.c.bf16 %v1031_v33, %v1031_v33  ;;  %v1029_v43 = vadd.f32 %v2107_v34, %v990_v11  ;;  %v993_v36 = vadd.f32 %v1488_v6, %v587_v1  ;;  %v579_v37 = vadd.f32 %v578_v19, %v2068_v14 }
  0xff   :  { %v1457_v15 = vpop.f32.mrf.mxu1  ;;  %v891_v48 = vpop.f32.mrf.mxu0 }
 0x100   :  { %1192 = vst.msk [vmem:[%s2297_s3 + $0x18] sm:$0xf] %vm1185_vm3, %v1334_v42  ;;  %v1332_v3 = vpack.c.bf16 %v1029_v43, %v1029_v43  ;;  %v1032_v27 = vadd.f32 %v2107_v34, %v993_v36  ;;  %v991_v29 = vadd.f32 %v878_v13, %v579_v37  ;;  %v600_v35 = vadd.f32 %v1457_v15, %v2072_v30 }
 0x101   :  { %v591_v10 = vpop.f32.mrf.mxu1  ;;  %v1492_v62 = vpop.f32.mrf.mxu0 }
 0x102   :  { %1190 = vst.msk [vmem:[%s2297_s3 + $0x10] sm:$0xf] %vm1185_vm3, %v1332_v3  ;;  %v1335_v14 = vpack.c.bf16 %v1032_v27, %v1032_v27  ;;  %v1030_v16 = vadd.f32 %v2107_v34, %v991_v29  ;;  %v996_v7 = vadd.f32 %v1491_v26, %v600_v35  ;;  %v592_v45 = vadd.f32 %v591_v10, %v2076_v17 }
 0x103   :  { %v1458_v47 = vpop.f32.mrf.mxu1  ;;  %v894_v2 = vpop.f32.mrf.mxu0 }
 0x104   :  { %1193 = vst.msk [vmem:[%s2297_s3 + $0x1c] sm:$0xf] %vm1185_vm3, %v1335_v14  ;;  %v1333_v30 = vpack.c.bf16 %v1030_v16, %v1030_v16  ;;  %v1035_v8 = vadd.f32 %v2107_v34, %v996_v7  ;;  %v994_v31 = vadd.f32 %v891_v48, %v592_v45  ;;  %v603_v38 = vadd.f32 %v1458_v47, %v2080_v41 }
 0x105   :  { %v594_v50 = vpop.f32.mrf.mxu1  ;;  %v1495_v21 = vpop.f32.mrf.mxu0 }
 0x106   :  { %1191 = vst.msk [vmem:[%s2297_s3 + $0x14] sm:$0xf] %vm1185_vm3, %v1333_v30  ;;  %v1338_v17 = vpack.c.bf16 %v1035_v8, %v1035_v8  ;;  %v1033_v18 = vadd.f32 %v2107_v34, %v994_v31  ;;  %v997_v5 = vadd.f32 %v1492_v62, %v603_v38  ;;  %v595_v56 = vadd.f32 %v594_v50, %v2084_v25 }
 0x107   :  { %v1461_v59 = vpop.f32.mrf.mxu1  ;;  %v907_v6 = vpop.f32.mrf.mxu0 }
 0x108   :  { %1196 = vst.msk [vmem:[%s2297_s3 + $0x28] sm:$0xf] %vm1185_vm3, %v1338_v17  ;;  %v1336_v41 = vpack.c.bf16 %v1033_v18, %v1033_v18  ;;  %v1036_v60 = vadd.f32 %v2107_v34, %v997_v5  ;;  %v995_v9 = vadd.f32 %v894_v2, %v595_v56  ;;  %v616_v23 = vadd.f32 %v1461_v59, %v2088_v46 }
 0x109   :  { %v607_v39 = vpop.f32.mrf.mxu1  ;;  %v1496_v1 = vpop.f32.mrf.mxu0 }
 0x10a   :  { %1194 = vst.msk [vmem:[%s2297_s3 + $0x20] sm:$0xf] %vm1185_vm3, %v1336_v41  ;;  %v1339_v25 = vpack.c.bf16 %v1036_v60, %v1036_v60  ;;  %v1034_v4 = vadd.f32 %v2107_v34, %v995_v9  ;;  %v1000_v33 = vadd.f32 %v1495_v21, %v616_v23  ;;  %v608_v11 = vadd.f32 %v607_v39, %v2092_v0 }
 0x10b   :  { %v1462_v13 = vpop.f32.mrf.mxu1  ;;  %v910_v36 = vpop.f32.mrf.mxu0 }
 0x10c   :  { %1197 = vst.msk [vmem:[%s2297_s3 + $0x2c] sm:$0xf] %vm1185_vm3, %v1339_v25  ;;  %v1337_v46 = vpack.c.bf16 %v1034_v4, %v1034_v4  ;;  %v1039_v19 = vadd.f32 %v2107_v34, %v1000_v33  ;;  %v998_v42 = vadd.f32 %v907_v6, %v608_v11  ;;  %v619_v43 = vadd.f32 %v1462_v13, %v2096_v51 }
 0x10d   :  { %v610_v37 = vpop.f32.mrf.mxu1  ;;  %v1499_v27 = vpop.f32.mrf.mxu0 }
 0x10e   :  { %1195 = vst.msk [vmem:[%s2297_s3 + $0x24] sm:$0xf] %vm1185_vm3, %v1337_v46  ;;  %v1342_v0 = vpack.c.bf16 %v1039_v19, %v1039_v19  ;;  %v1037_v26 = vadd.f32 %v2107_v34, %v998_v42  ;;  %v1001_v15 = vadd.f32 %v1496_v1, %v619_v43  ;;  %v611_v3 = vadd.f32 %v610_v37, %v2100_v49 }
 0x10f   :  { %v1465_v29 = vpop.f32.mrf.mxu1  ;;  %v923_v14 = vpop.f32.mrf.mxu0 }
 0x110   :  { %1200 = vst.msk [vmem:[%s2297_s3 + $0x38] sm:$0xf] %vm1185_vm3, %v1342_v0  ;;  %v1340_v51 = vpack.c.bf16 %v1037_v26, %v1037_v26  ;;  %v1040_v35 = vadd.f32 %v2107_v34, %v1001_v15  ;;  %v999_v48 = vadd.f32 %v910_v36, %v611_v3  ;;  %v632_v10 = vadd.f32 %v1465_v29, %v2054_v53 }
 0x111   :  { %v623_v16 = vpop.f32.mrf.mxu1  ;;  %v1500_v47 = vpop.f32.mrf.mxu0 }
 0x112   :  { %1198 = vst.msk [vmem:[%s2297_s3 + $0x30] sm:$0xf] %vm1185_vm3, %v1340_v51  ;;  %v1343_v49 = vpack.c.bf16 %v1040_v35, %v1040_v35  ;;  %v1038_v7 = vadd.f32 %v2107_v34, %v999_v48  ;;  %v1004_v45 = vadd.f32 %v1499_v27, %v632_v10  ;;  %v624_v62 = vadd.f32 %v623_v16, %v2056_v32 }
 0x113   :  { %v1466_v30 = vpop.f32.mrf.mxu1  ;;  %v926_v2 = vpop.f32.mrf.mxu0 }
 0x114   :  { %1201 = vst.msk [vmem:[%s2297_s3 + $0x3c] sm:$0xf] %vm1185_vm3, %v1343_v49  ;;  %v1341_v53 = vpack.c.bf16 %v1038_v7, %v1038_v7  ;;  %v1043_v8 = vadd.f32 %v2107_v34, %v1004_v45  ;;  %v1002_v31 = vadd.f32 %v923_v14, %v624_v62  ;;  %v635_v38 = vadd.f32 %v1466_v30, %v2058_v52 }
 0x115   :  { %v626_v50 = vpop.f32.mrf.mxu1  ;;  %v1503_v56 = vpop.f32.mrf.mxu0 }
 0x116   :  { %1199 = vst.msk [vmem:[%s2297_s3 + $0x34] sm:$0xf] %vm1185_vm3, %v1341_v53  ;;  %v1346_v32 = vpack.c.bf16 %v1043_v8, %v1043_v8  ;;  %v1041_v17 = vadd.f32 %v2107_v34, %v1002_v31  ;;  %v1005_v18 = vadd.f32 %v1500_v47, %v635_v38  ;;  %v627_v5 = vadd.f32 %v626_v50, %v2060_v61 }
 0x117   :  { %v1469_v21 = vpop.f32.mrf.mxu1  ;;  %v939_v9 = vpop.f32.mrf.mxu0 }
 0x118   :  { %1204 = vst.msk [vmem:[%s2297_s3 + $0x48] sm:$0xf] %vm1185_vm3, %v1346_v32  ;;  %v1344_v52 = vpack.c.bf16 %v1041_v17, %v1041_v17  ;;  %v1044_v59 = vadd.f32 %v2107_v34, %v1005_v18  ;;  %v1003_v41 = vadd.f32 %v926_v2, %v627_v5  ;;  %v648_v60 = vadd.f32 %v1469_v21, %v2062_v20 }
 0x119   :  { %v639_v23 = vpop.f32.mrf.mxu1  ;;  %v1504_v4 = vpop.f32.mrf.mxu0 }
 0x11a   :  { %1202 = vst.msk [vmem:[%s2297_s3 + $0x40] sm:$0xf] %vm1185_vm3, %v1344_v52  ;;  %v1347_v61 = vpack.c.bf16 %v1044_v59, %v1044_v59  ;;  %v1042_v6 = vadd.f32 %v2107_v34, %v1003_v41  ;;  %v1008_v39 = vadd.f32 %v1503_v56, %v648_v60  ;;  %v640_v25 = vadd.f32 %v639_v23, %v2064_v44 }
 0x11b   :  { %v1470_v33 = vpop.f32.mrf.mxu1  ;;  %v942_v46 = vpop.f32.mrf.mxu0 }
 0x11c   :  { %1205 = vst.msk [vmem:[%s2297_s3 + $0x4c] sm:$0xf] %vm1185_vm3, %v1347_v61  ;;  %v1345_v20 = vpack.c.bf16 %v1042_v6, %v1042_v6  ;;  %v1047_v11 = vadd.f32 %v2107_v34, %v1008_v39  ;;  %v1006_v1 = vadd.f32 %v939_v9, %v640_v25  ;;  %v651_v13 = vadd.f32 %v1470_v33, %v2066_v24 }
 0x11d   :  { %v642_v19 = vpop.f32.mrf.mxu1  ;;  %v1507_v37 = vpop.f32.mrf.mxu0 }
 0x11e   :  { %1203 = vst.msk [vmem:[%s2297_s3 + $0x44] sm:$0xf] %vm1185_vm3, %v1345_v20  ;;  %v1350_v44 = vpack.c.bf16 %v1047_v11, %v1047_v11  ;;  %v1045_v42 = vadd.f32 %v2107_v34, %v1006_v1  ;;  %v1009_v43 = vadd.f32 %v1504_v4, %v651_v13  ;;  %v643_v36 = vadd.f32 %v642_v19, %v2070_v12 }
 0x11f   :  { %v1473_v0 = vpop.f32.mrf.mxu1  ;;  %v955_v27 = vpop.f32.mrf.mxu0 }
 0x120   :  { %1208 = vst.msk [vmem:[%s2297_s3 + $0x58] sm:$0xf] %vm1185_vm3, %v1350_v44  ;;  %v1348_v24 = vpack.c.bf16 %v1045_v42, %v1045_v42  ;;  %v1048_v26 = vadd.f32 %v2107_v34, %v1009_v43  ;;  %v1007_v15 = vadd.f32 %v942_v46, %v643_v36  ;;  %v664_v3 = vadd.f32 %v1473_v0, %v2074_v22 }
 0x121   :  { %v655_v29 = vpop.f32.mrf.mxu1  ;;  %v1508_v10 = vpop.f32.mrf.mxu0 }
 0x122   :  { %1206 = vst.msk [vmem:[%s2297_s3 + $0x50] sm:$0xf] %vm1185_vm3, %v1348_v24  ;;  %v1351_v12 = vpack.c.bf16 %v1048_v26, %v1048_v26  ;;  %v1046_v51 = vadd.f32 %v2107_v34, %v1007_v15  ;;  %v1012_v35 = vadd.f32 %v1507_v37, %v664_v3  ;;  %v656_v48 = vadd.f32 %v655_v29, %v2078_v57 }
 0x123   :  { %v1474_v14 = vpop.f32.mrf.mxu1  ;;  %v958_v45 = vpop.f32.mrf.mxu0 }
 0x124   :  { %1209 = vst.msk [vmem:[%s2297_s3 + $0x5c] sm:$0xf] %vm1185_vm3, %v1351_v12  ;;  %v1349_v22 = vpack.c.bf16 %v1046_v51, %v1046_v51  ;;  %v1051_v16 = vadd.f32 %v2107_v34, %v1012_v35  ;;  %v1010_v49 = vadd.f32 %v955_v27, %v656_v48  ;;  %v667_v7 = vadd.f32 %v1474_v14, %v2082_v63 }
 0x125   :  { %v658_v62 = vpop.f32.mrf.mxu1  ;;  %v1511_v8 = vpop.f32.mrf.mxu0 }
 0x126   :  { %1207 = vst.msk [vmem:[%s2297_s3 + $0x54] sm:$0xf] %vm1185_vm3, %v1349_v22  ;;  %v1354_v57 = vpack.c.bf16 %v1051_v16, %v1051_v16  ;;  %v1049_v47 = vadd.f32 %v2107_v34, %v1010_v49  ;;  %v1013_v30 = vadd.f32 %v1508_v10, %v667_v7  ;;  %v659_v53 = vadd.f32 %v658_v62, %v2086_v28 }
 0x127   :  { %v1477_v31 = vpop.f32.mrf.mxu1  ;;  %v971_v32 = vpop.f32.mrf.mxu0 }
 0x128   :  { %1212 = vst.msk [vmem:[%s2297_s3 + $0x68] sm:$0xf] %vm1185_vm3, %v1354_v57  ;;  %v1352_v63 = vpack.c.bf16 %v1049_v47, %v1049_v47  ;;  %v1052_v38 = vadd.f32 %v2107_v34, %v1013_v30  ;;  %v1011_v2 = vadd.f32 %v958_v45, %v659_v53  ;;  %v680_v50 = vadd.f32 %v1477_v31, %v2090_v55 }
 0x129   :  { %v671_v17 = vpop.f32.mrf.mxu1  ;;  %v1512_v52 = vpop.f32.mrf.mxu0 }
 0x12a   :  { %1210 = vst.msk [vmem:[%s2297_s3 + $0x60] sm:$0xf] %vm1185_vm3, %v1352_v63  ;;  %v1355_v28 = vpack.c.bf16 %v1052_v38, %v1052_v38  ;;  %v1050_v18 = vadd.f32 %v2107_v34, %v1011_v2  ;;  %v1016_v5 = vadd.f32 %v1511_v8, %v680_v50  ;;  %v672_v56 = vadd.f32 %v671_v17, %v2094_v40 }
 0x12b   :  { %v1478_v21 = vpop.f32.mrf.mxu1  ;;  %v974_v39 = vpop.f32.mrf.mxu0 }
 0x12c   :  { %1213 = vst.msk [vmem:[%s2297_s3 + $0x6c] sm:$0xf] %vm1185_vm3, %v1355_v28  ;;  %v1353_v55 = vpack.c.bf16 %v1050_v18, %v1050_v18  ;;  %v1055_v59 = vadd.f32 %v2107_v34, %v1016_v5  ;;  %v1014_v41 = vadd.f32 %v971_v32, %v672_v56  ;;  %v683_v60 = vadd.f32 %v1478_v21, %v2098_v58 }
 0x12d   :  { %v674_v9 = vpop.f32.mrf.mxu1 }
 0x12e   :  { %1211 = vst.msk [vmem:[%s2297_s3 + $0x64] sm:$0xf] %vm1185_vm3, %v1353_v55  ;;  %v1358_v40 = vpack.c.bf16 %v1055_v59, %v1055_v59  ;;  %v1053_v23 = vadd.f32 %v2107_v34, %v1014_v41  ;;  %v1017_v61 = vadd.f32 %v1512_v52, %v683_v60  ;;  %v675_v6 = vadd.f32 %v674_v9, %v2102_v54 }
 0x130   :  { %1216 = vst.msk [vmem:[%s2297_s3 + $0x78] sm:$0xf] %vm1185_vm3, %v1358_v40  ;;  %v1356_v25 = vpack.c.bf16 %v1053_v23, %v1053_v23  ;;  %v1056_v58 = vadd.f32 %v2107_v34, %v1017_v61  ;;  %v1015_v4 = vadd.f32 %v974_v39, %v675_v6 }
 0x132   :  { %1214 = vst.msk [vmem:[%s2297_s3 + $0x70] sm:$0xf] %vm1185_vm3, %v1356_v25  ;;  %v1359_v33 = vpack.c.bf16 %v1056_v58, %v1056_v58  ;;  %v1054_v20 = vadd.f32 %v2107_v34, %v1015_v4 }
 0x134   :  { %1217 = vst.msk [vmem:[%s2297_s3 + $0x7c] sm:$0xf] %vm1185_vm3, %v1359_v33  ;;  %v1357_v54 = vpack.c.bf16 %v1054_v20, %v1054_v20 }
 0x136   :  { %1215 = vst.msk [vmem:[%s2297_s3 + $0x74] sm:$0xf] %vm1185_vm3, %v1357_v54 }

</bundles_post_ra>
